<compile_context>
chip_gen: v5e
topology: v5e:2x2
jax: 0.10.0
libtpu: 0.0.40
codegen_flags: <defaults>
</compile_context>

<pallas_src>
import functools

import jax
import jax.numpy as jnp
from jax.experimental import pallas as pl
from jax.experimental.pallas import tpu as pltpu

EPS = 1e-5
_VMEM_LIMIT = 32 * 1024 * 1024   # raise v5e's 16 MiB default, stay under v7x's 64 MiB
_HW_TILE_CAP = 2048              # lanes per HW tile in the two-phase path
_FUSED_BYTES_CAP = 12 * 1024 * 1024  # per-batch VMEM footprint cap for the fused path


def _pick_hw_tile(hw: int, cap: int = _HW_TILE_CAP) -> int:
    """Largest divisor of hw that is a multiple of 128 and <= cap (else full hw)."""
    if hw % 128 != 0:
        return hw  # block must equal the full array dim in this case
    best = 128
    for t in range(128, min(hw, cap) + 1, 128):
        if hw % t == 0:
            best = t
    return best


# ----------------------------------------------------------------------------
# Fused path: one kernel per batch (stats + normalized 1x1 conv)
# ----------------------------------------------------------------------------
def _fused_kernel(x_ref, w_ref, b_ref, wrow_ref, o_ref, *, n_elems):
    # x_ref: (1, C, HW); w_ref: (C, C); b_ref / wrow_ref: (C, 1); o_ref: (1, C, HW)
    x = x_ref[0]                                    # (C, HW), activation dtype
    xf = x.astype(jnp.float32)

    n = jnp.float32(n_elems)
    mean = jnp.sum(xf) / n
    var = jnp.maximum(jnp.sum(xf * xf) / n - mean * mean, 0.0)
    inv = jax.lax.rsqrt(var + jnp.float32(EPS))

    # W_eff @ x on the MXU (raw activations; normalization folded into epilogue)
    wx = jnp.dot(w_ref[...], x, preferred_element_type=jnp.float32)   # (C, HW) f32

    # y = inv * (W_eff @ x) + (b_eff - inv*mean*rowsum(W_eff))
    shift = b_ref[...] - (inv * mean) * wrow_ref[...]                  # (C, 1)
    o_ref[...] = (wx * inv + shift)[None].astype(o_ref.dtype)


# ----------------------------------------------------------------------------
# Two-phase path: phase 1 stats
# ----------------------------------------------------------------------------
def _stats_kernel(x_ref, stats_ref, acc_ref, *, n_elems):
    # x_ref: (1, C, T_hw) block; stats_ref: (1, 2, 128) VMEM out; acc_ref: SMEM (2,)
    h = pl.program_id(1)

    @pl.when(h == 0)
    def _init():
        acc_ref[0] = jnp.float32(0.0)
        acc_ref[1] = jnp.float32(0.0)

    x = x_ref[...].astype(jnp.float32)
    acc_ref[0] += jnp.sum(x)          # single pass: sum
    acc_ref[1] += jnp.sum(x * x)      # and sum of squares

    @pl.when(h == pl.num_programs(1) - 1)
    def _finalize():
        n = jnp.float32(n_elems)
        mean = acc_ref[0] / n
        var = jnp.maximum(acc_ref[1] / n - mean * mean, 0.0)
        inv = jax.lax.rsqrt(var + jnp.float32(EPS))
        # row 0 <- mean, row 1 <- inv (broadcast across the 128 lanes).
        row = jax.lax.broadcasted_iota(jnp.int32, stats_ref.shape, 1)
        stats_ref[...] = jnp.where(row == 0, mean, inv)


# ----------------------------------------------------------------------------
# Two-phase path: phase 2 normalized 1x1 conv
# ----------------------------------------------------------------------------
def _apply_kernel(stats_ref, x_ref, w_ref, b_ref, wrow_ref, o_ref):
    # stats_ref: (B, 2) in SMEM; x_ref: (1, C, T_hw); w_ref: (C, C);
    # b_ref / wrow_ref: (C, 1); o_ref: (1, C, T_hw)
    bidx = pl.program_id(0)
    mean = stats_ref[bidx, 0]
    inv = stats_ref[bidx, 1]

    wx = jnp.dot(w_ref[...], x_ref[0], preferred_element_type=jnp.float32)

    shift = b_ref[...] - (inv * mean) * wrow_ref[...]          # (C, 1)
    o_ref[...] = (wx * inv + shift)[None].astype(o_ref.dtype)


# ----------------------------------------------------------------------------
# Wrapper
# ----------------------------------------------------------------------------
def pre_normalization(x, gamma, beta, conv_w, conv_b, *, force_two_phase=False):
    """x: [B, C, H, W] (NCHW). Returns fn(GroupNorm(1, C)(x)) with fn = 1x1 conv."""
    B, C, H, W = x.shape
    HW = H * W
    x3 = x.reshape(B, C, HW)

    # ---- fold the GroupNorm affine into the 1x1-conv weight / bias ----------
    w2 = conv_w.reshape(C, C).astype(jnp.float32)
    g = gamma.astype(jnp.float32).reshape(1, C)
    bt = beta.astype(jnp.float32).reshape(C, 1)
    cb = conv_b.astype(jnp.float32).reshape(C, 1)
    w_eff_f32 = w2 * g                                     # scale columns by gamma
    b_eff = cb + w2 @ bt                                   # absorb beta into bias
    w_row = jnp.sum(w_eff_f32, axis=1, keepdims=True)      # rowsum(W_eff), (C, 1)
    w_eff = w_eff_f32.astype(x.dtype)                      # matmul in activation dtype

    itemsize = jnp.dtype(x.dtype).itemsize

    # Per-batch VMEM footprint of the fused path (double-buffered in/out slabs,
    # f32 matmul result, weights).  Choose fused when it comfortably fits.
    fused_bytes = (2 * C * HW * itemsize      # x slab, double-buffered
                   + 2 * C * HW * itemsize    # out slab, double-buffered
                   + C * HW * 4               # f32 wx temporary
                   + C * C * itemsize + 2 * C * 4)
    use_fused = (not force_two_phase) and fused_bytes <= _FUSED_BYTES_CAP

    if use_fused:
        out3 = pl.pallas_call(
            functools.partial(_fused_kernel, n_elems=C * HW),
            out_shape=jax.ShapeDtypeStruct((B, C, HW), x.dtype),
            grid_spec=pltpu.PrefetchScalarGridSpec(
                num_scalar_prefetch=0,
                grid=(B,),
                in_specs=[
                    pl.BlockSpec((1, C, HW), lambda b: (b, 0, 0)),   # x slab
                    pl.BlockSpec((C, C), lambda b: (0, 0)),          # W_eff (resident)
                    pl.BlockSpec((C, 1), lambda b: (0, 0)),          # b_eff
                    pl.BlockSpec((C, 1), lambda b: (0, 0)),          # rowsum(W_eff)
                ],
                out_specs=pl.BlockSpec((1, C, HW), lambda b: (b, 0, 0)),
            ),
            compiler_params=pltpu.CompilerParams(
                dimension_semantics=("parallel",),
                vmem_limit_bytes=_VMEM_LIMIT,
            ),
            cost_estimate=pl.CostEstimate(
                flops=2 * B * C * C * HW + 3 * B * C * HW,
                transcendentals=B,
                bytes_accessed=2 * B * C * HW * itemsize + C * C * itemsize,
            ),
        )(x3, w_eff, b_eff, w_row)
        return out3.reshape(B, C, H, W)

    # ------------------------- two-phase path --------------------------------
    t_hw = _pick_hw_tile(HW)
    n_hw = HW // t_hw

    # ---- phase 1: per-batch mean / rsqrt(var + eps) --------------------------
    stats_full = pl.pallas_call(
        functools.partial(_stats_kernel, n_elems=C * HW),
        out_shape=jax.ShapeDtypeStruct((B, 2, 128), jnp.float32),
        grid_spec=pltpu.PrefetchScalarGridSpec(
            num_scalar_prefetch=0,
            grid=(B, n_hw),
            in_specs=[pl.BlockSpec((1, C, t_hw), lambda b, h: (b, 0, h))],
            out_specs=pl.BlockSpec((1, 2, 128), lambda b, h: (b, 0, 0)),
            scratch_shapes=[pltpu.SMEM((2,), jnp.float32)],
        ),
        compiler_params=pltpu.CompilerParams(
            dimension_semantics=("parallel", "arbitrary"),
            vmem_limit_bytes=_VMEM_LIMIT,
        ),
        cost_estimate=pl.CostEstimate(
            flops=3 * B * C * HW,
            transcendentals=B,
            bytes_accessed=B * C * HW * itemsize,
        ),
    )(x3)
    stats = stats_full[:, :, 0]   # (B, 2) f32: [mean, rsqrt(var + eps)]

    # ---- phase 2: normalized 1x1 conv, HW-tiled, both grid axes parallel ----
    out3 = pl.pallas_call(
        _apply_kernel,
        out_shape=jax.ShapeDtypeStruct((B, C, HW), x.dtype),
        grid_spec=pltpu.PrefetchScalarGridSpec(
            num_scalar_prefetch=0,
            grid=(B, n_hw),
            in_specs=[
                pl.BlockSpec(memory_space=pltpu.MemorySpace.SMEM),    # stats (B, 2)
                pl.BlockSpec((1, C, t_hw), lambda b, h: (b, 0, h)),   # x tile
                pl.BlockSpec((C, C), lambda b, h: (0, 0)),            # W_eff (resident)
                pl.BlockSpec((C, 1), lambda b, h: (0, 0)),            # b_eff
                pl.BlockSpec((C, 1), lambda b, h: (0, 0)),            # rowsum(W_eff)
            ],
            out_specs=pl.BlockSpec((1, C, t_hw), lambda b, h: (b, 0, h)),
        ),
        compiler_params=pltpu.CompilerParams(
            dimension_semantics=("parallel", "parallel"),
            vmem_limit_bytes=_VMEM_LIMIT,
        ),
        cost_estimate=pl.CostEstimate(
            flops=2 * B * C * C * HW,
            transcendentals=0,
            bytes_accessed=2 * B * C * HW * itemsize + C * C * itemsize,
        ),
    )(stats, x3, w_eff, b_eff, w_row)

    return out3.reshape(B, C, H, W)


# ----------------------------------------------------------------------------
# Reference & test
# ----------------------------------------------------------------------------
def _reference(x, gamma, beta, conv_w, conv_b):
    B, C, H, W = x.shape
    xf = x.astype(jnp.float32).reshape(B, -1)
    mean = xf.mean(axis=1, keepdims=True)
    var = ((xf - mean) ** 2).mean(axis=1, keepdims=True)
    xn = ((xf - mean) / jnp.sqrt(var + EPS)).reshape(B, C, H, W)
    xn = xn * gamma.reshape(1, C, 1, 1) + beta.reshape(1, C, 1, 1)
    y = jnp.einsum("oc,bchw->bohw", conv_w.reshape(C, C), xn)
    return y + conv_b.reshape(1, C, 1, 1)


if __name__ == "__main__":
    key = jax.random.PRNGKey(0)
    kx, kg, kb, kw, kc = jax.random.split(key, 5)

    B, C, H, W = 2, 4, 16, 16
    x = jax.random.normal(kx, (B, C, H, W), dtype=jnp.float32)

    # GroupNorm affine params (non-trivial, to exercise the fold-into-conv path).
    gamma = 1.0 + 0.1 * jax.random.normal(kg, (C,), dtype=jnp.float32)
    beta = 0.1 * jax.random.normal(kb, (C,), dtype=jnp.float32)

    # fn = 1x1 Conv2d(C -> C): deterministic random weights.
    conv_w = jax.random.normal(kw, (C, C, 1, 1), dtype=jnp.float32) * 0.1
    conv_b = jax.random.normal(kc, (C,), dtype=jnp.float32) * 0.1

    ref = _reference(x, gamma, beta, conv_w, conv_b)

    # Fused single-pass path (used for small/medium per-batch slabs).
    out = jax.block_until_ready(pre_normalization(x, gamma, beta, conv_w, conv_b))
    assert out.shape == (B, C, H, W)
    assert jnp.allclose(out, ref, atol=1e-4, rtol=1e-4), float(
        jnp.max(jnp.abs(out - ref)))

    # Two-phase tiled path (used for large per-batch slabs) -- exercised here too.
    out2 = jax.block_until_ready(
        pre_normalization(x, gamma, beta, conv_w, conv_b, force_two_phase=True))
    assert jnp.allclose(out2, ref, atol=1e-4, rtol=1e-4), float(
        jnp.max(jnp.abs(out2 - ref)))

    print("KERNEL_OK")
</pallas_src>

<mosaic_0001>
module attributes {stable_mosaic.version = 11 : i64} {
  func.func @_fused_kernel(%arg0: i32, %arg1: memref<1x4x256xf32, #tpu.memory_space<vmem>>, %arg2: memref<4x4xf32, #tpu.memory_space<vmem>>, %arg3: memref<4x1xf32, #tpu.memory_space<vmem>>, %arg4: memref<4x1xf32, #tpu.memory_space<vmem>>, %arg5: memref<1x4x256xf32, #tpu.memory_space<vmem>>) attributes {dimension_semantics = [#tpu.dimension_semantics<parallel>], iteration_bounds = array<i64: 2>, scalar_prefetch = 0 : i64, scratch_operands = 0 : i64, tpu.core_type = #tpu.core_type<tc>, window_params = [{transform_indices = @transform_0, window_bounds = array<i64: 1, 4, 256>}, {pipeline_mode = #tpu.pipeline_mode<synchronous>, transform_indices = @transform_1, window_bounds = array<i64: 4, 4>}, {pipeline_mode = #tpu.pipeline_mode<synchronous>, transform_indices = @transform_2, window_bounds = array<i64: 4, 1>}, {pipeline_mode = #tpu.pipeline_mode<synchronous>, transform_indices = @transform_3, window_bounds = array<i64: 4, 1>}, {transform_indices = @transform_4, window_bounds = array<i64: 1, 4, 256>}]} {
    %c0 = arith.constant 0 : index
    %c0_0 = arith.constant 0 : index
    %c0_1 = arith.constant 0 : index
    %0 = vector.load %arg1[%c0, %c0_0, %c0_1] : memref<1x4x256xf32, #tpu.memory_space<vmem>>, vector<1x4x256xf32>
    %1 = vector.shape_cast %0 : vector<1x4x256xf32> to vector<4x256xf32>
    %2 = vector.shape_cast %1 : vector<4x256xf32> to vector<1x4x256xf32>
    %cst = arith.constant dense<0.000000e+00> : vector<1xf32>
    %3 = vector.multi_reduction <add>, %2, %cst [1, 2] : vector<1x4x256xf32> to vector<1xf32>
    %4 = vector.shape_cast %3 : vector<1xf32> to vector<1x1x1xf32>
    %5 = vector.extract %4[0, 0, 0] : f32 from vector<1x1x1xf32>
    %cst_2 = arith.constant 1.024000e+03 : f32
    %6 = arith.divf %5, %cst_2 : f32
    %7 = arith.mulf %1, %1 : vector<4x256xf32>
    %8 = vector.shape_cast %7 : vector<4x256xf32> to vector<1x4x256xf32>
    %cst_3 = arith.constant dense<0.000000e+00> : vector<1xf32>
    %9 = vector.multi_reduction <add>, %8, %cst_3 [1, 2] : vector<1x4x256xf32> to vector<1xf32>
    %10 = vector.shape_cast %9 : vector<1xf32> to vector<1x1x1xf32>
    %11 = vector.extract %10[0, 0, 0] : f32 from vector<1x1x1xf32>
    %cst_4 = arith.constant 1.024000e+03 : f32
    %12 = arith.divf %11, %cst_4 : f32
    %13 = arith.mulf %6, %6 : f32
    %14 = arith.subf %12, %13 : f32
    %cst_5 = arith.constant 0.000000e+00 : f32
    %15 = arith.maximumf %14, %cst_5 : f32
    %cst_6 = arith.constant 9.99999974E-6 : f32
    %16 = arith.addf %15, %cst_6 : f32
    %17 = math.rsqrt %16 : f32
    %c0_7 = arith.constant 0 : index
    %c0_8 = arith.constant 0 : index
    %18 = vector.load %arg2[%c0_7, %c0_8] : memref<4x4xf32, #tpu.memory_space<vmem>>, vector<4x4xf32>
    %cst_9 = arith.constant dense<0.000000e+00> : vector<4x256xf32>
    %19 = tpu.matmul %18, %1, %cst_9 {dimension_numbers = #tpu.dot_dimension_numbers<[1], [0], [0], [1], [0, 0, 1, 1], [], []>} : vector<4x4xf32>, vector<4x256xf32>, vector<4x256xf32> -> vector<4x256xf32>
    %c0_10 = arith.constant 0 : index
    %c0_11 = arith.constant 0 : index
    %20 = vector.load %arg3[%c0_10, %c0_11] : memref<4x1xf32, #tpu.memory_space<vmem>>, vector<4x1xf32>
    %21 = arith.mulf %17, %6 : f32
    %c0_12 = arith.constant 0 : index
    %c0_13 = arith.constant 0 : index
    %22 = vector.load %arg4[%c0_12, %c0_13] : memref<4x1xf32, #tpu.memory_space<vmem>>, vector<4x1xf32>
    %23 = vector.broadcast %21 : f32 to vector<4x1xf32>
    %24 = arith.mulf %23, %22 : vector<4x1xf32>
    %25 = arith.subf %20, %24 : vector<4x1xf32>
    %26 = vector.broadcast %17 : f32 to vector<4x256xf32>
    %27 = arith.mulf %19, %26 : vector<4x256xf32>
    %28 = vector.broadcast %25 : vector<4x1xf32> to vector<4x256xf32>
    %29 = arith.addf %27, %28 : vector<4x256xf32>
    %30 = vector.shape_cast %29 : vector<4x256xf32> to vector<1x4x256xf32>
    %c0_14 = arith.constant 0 : index
    %c0_15 = arith.constant 0 : index
    %c0_16 = arith.constant 0 : index
    %31 = vector.load %arg5[%c0_14, %c0_15, %c0_16] : memref<1x4x256xf32, #tpu.memory_space<vmem>>, vector<1x4x256xf32>
    tpu.vector_store %arg5[%c0_14, %c0_15, %c0_16], %30 {strides = array<i32>} : memref<1x4x256xf32, #tpu.memory_space<vmem>>, vector<1x4x256xf32>,
    return
  }
  func.func @transform_0(%arg0: i32) -> (i32, i32, i32) {
    %c0_i32 = arith.constant 0 : i32
    %c0_i32_0 = arith.constant 0 : i32
    %c0_i32_1 = arith.constant 0 : i32
    return %arg0, %c0_i32, %c0_i32_0 : i32, i32, i32
  }
  func.func @transform_1(%arg0: i32) -> (i32, i32) {
    %c0_i32 = arith.constant 0 : i32
    %c0_i32_0 = arith.constant 0 : i32
    %c0_i32_1 = arith.constant 0 : i32
    return %c0_i32, %c0_i32_0 : i32, i32
  }
  func.func @transform_2(%arg0: i32) -> (i32, i32) {
    %c0_i32 = arith.constant 0 : i32
    %c0_i32_0 = arith.constant 0 : i32
    %c0_i32_1 = arith.constant 0 : i32
    return %c0_i32, %c0_i32_0 : i32, i32
  }
  func.func @transform_3(%arg0: i32) -> (i32, i32) {
    %c0_i32 = arith.constant 0 : i32
    %c0_i32_0 = arith.constant 0 : i32
    %c0_i32_1 = arith.constant 0 : i32
    return %c0_i32, %c0_i32_0 : i32, i32
  }
  func.func @transform_4(%arg0: i32) -> (i32, i32, i32) {
    %c0_i32 = arith.constant 0 : i32
    %c0_i32_0 = arith.constant 0 : i32
    %c0_i32_1 = arith.constant 0 : i32
    return %arg0, %c0_i32, %c0_i32_0 : i32, i32, i32
  }
}

</mosaic_0001>

<bundles_post_ra>
// kernel: tpu_custom_call.1
= control target key start
LH: loop header
LB: loop body
LE: loop exit
PB: predicated region body
PF: predicated region fallthrough
CT: control target
= control target key end

     0   :  { %9 = vsyncpa [#allocation3], 0  ;;  %s806_s0 = inlined_call_operand.hbm [shape: f32[2,4,256], index: 0, kind: input, shape index: {}]   ;;  %s807_s1 = inlined_call_operand.vmem [shape: f32[4,4], index: 1, kind: input, shape index: {}]   ;;  %s808_s2 = inlined_call_operand.vmem [shape: f32[4,1], index: 2, kind: input, shape index: {}]   ;;  %s809_s3 = inlined_call_operand.vmem [shape: f32[4,1], index: 3, kind: input, shape index: {}]   ;;  %s810_s4 = inlined_call_operand.hbm [shape: f32[2,4,256], index: 4, kind: output, shape index: {}]  }
   0x1   :  { %11 = vsyncpa [#allocation3 + $0x1], 0 }
   0x2   :  { %12 = vsyncpa [#allocation4], 0 }
   0x3   :  { %14 = vsyncpa [#allocation4 + $0x1], 0  ;;  %s659_s15 = smov 0   ;;  %s661_s16 = smov 0  }
   0x4   :  { %s663_s17 = smov 0   ;;  %s665_s18 = smov 0  }
   0x5 LB: > { %s680_s19 = sadd.s32 4294967295, %s629_s18   ;;  %s450_s20 = sadd.s32 4294967294, %s629_s18   ;;  %s629_s18 = sphi %s665_s18, %s820_s18   ;;  %s625_s17 = sphi %s663_s17, %s819_s17   ;;  %s621_s16 = sphi %s661_s16, %s818_s16   ;;  %s617_s15 = sphi %s659_s15, %s817_s15  }
   0x6   : > { %s684_s21 = sadd.s32 1, %s629_s18   ;;  %s27_s22 = sadd.s32 1, %s625_s17 }
   0x7   : > { %s24_s23 = ssub.s32 %s629_s18, %s684_s21  ;;  %p34_p0 = scmp.ne.s32.totalorder %s625_s17, %s621_s16 }
   0x8   : > { %p25_p1 = scmp.eq.s32.totalorder %s24_s23, 0  ;;  %p35_p2 = scmp.eq.s32.totalorder %s629_s18, 0 }
   0x9   : > { %p40_p3 = scmp.ne.s32.totalorder %s621_s16, %s617_s15  ;;  %p41_p4 = scmp.eq.s32.totalorder %s680_s19, 0 }
   0xa   : > { %s696_s24 = scalar_select %p25_p1, %s625_s17, %s27_s22  }
   0xb   : > { %p698_p5 = por %p35_p2, %p34_p0  ;;  %p702_p6 = por %p41_p4, %p40_p3 }
   0xc   : > { %p127_p7 = scmp.eq.s32.totalorder %s680_s19, 1  ;;  %p133_p8 = scmp.eq.s32.totalorder %s450_s20, 1 }
   0xd   : > { %p490_p10 = scmp.lt.s32.totalorder %s629_s18, 2  ;;  %s162_s29 = sand.u32 1, %s625_s17  }
   0xe   : > { %p709_p11 = por %p127_p7, %p34_p0  ;;  %p713_p12 = por %p133_p8, %p40_p3 }
   0xf   : > { %s468_s30 = sshll.u32 %s629_s18, 3  ;;  %s453_s5 = sshll.u32 %s162_s29, 3 }
  0x10   : > { %s171_s8 = scalar_lea.hbm %s806_s0, %s468_s30  ;;  %s166_s10 = scalar_lea.vmem [#allocation2], %s453_s5 }
  0x11   : > { %s173_s9 = sshll.u32 %s171_s8, 4  ;;  %s175_s11 = sshll.u32 %s166_s10, 4  ;;  %s174_s9 = int_to_ptr.hbm [resolvable:$true] %s173_s9  ;;  %s176_s11 = int_to_ptr.vmem [resolvable:$true] %s175_s11 }
  0x12   : > { %p724_p13 = pnand %p490_p10, %p698_p5  ;;  %p456_p0 = scmp.ge.s32.totalorder %s629_s18, 1 }
  0x13   : > { %p180_p1 = scmp.lt.s32.totalorder %s629_s18, 3  ;;  %s163_s13 = scalar_lea.sflag [#allocation3], %s162_s29 }
  0x14   : > { %s533_s14 = sshra.s32 %s174_s9, 4  ;;  %p537_p3 = pneg %p724_p13  ;;  %s534_s14 = int_to_ptr.hbm [resolvable:$true] %s533_s14 }
  0x15   : > { %s535_s20 = scalar_lea.hbm %s534_s14, 8  ;;  %s540_s25 = scalar_lea.hbm %s806_s0, 16 }
  0x16   : > { %p536_p2 = scmp.ne.s32.totalorder %s534_s14, %s535_s20  ;;  %p541_p5 = scmp.lt.s32.totalorder %s534_s14, %s806_s0 }
  0x17   : > { %p542_p8 = scmp.lt.s32.totalorder %s540_s25, %s535_s20 }
  0x18   : > { %p538_p4 = pnand %p537_p3, %p536_p2 }
  0x19   : > { %p543_p10 = por %p542_p8, %p541_p5 }
  0x1a   : > { %p539_p7 = pneg %p538_p4 }
  0x1c   : > { %p544_p9 = pnand %p543_p10, %p539_p7 }
  0x1e   : > { %547 = shalt.err (!%p544_p9)
}
  0x1f   : > { %485 = dma.hbm_to_vmem [thread:$0]  (!%p724_p13), %s174_s9, 128, %s176_s11, %s163_s13  }
  0x20   : > { %p181_p2 = pnand %p456_p0, %p180_p1 }
  0x21   : > { %s745_s29 = sand.u32 (!%p181_p2), 1, %s621_s16  }
  0x22   : > { %184 = sbr.rel (%p181_p2) target bundleno = 444 (0x1bc), region = 36  ;;  %s457_s6 = sshll.u32 (!%p181_p2), %s745_s29, 3 }
  0x23   : > { %s187_s7 = scalar_lea.sflag (!%p181_p2), [#allocation3], %s745_s29  ;;  %s190_s8 = scalar_lea.vmem (!%p181_p2), [#allocation2], %s457_s6 }
  0x27   : > { %608 = dma.done.wait (%p702_p6), %s187_s7, 128  }
  0x28   : > { %610 = vsyncadd (%p702_p6), %s187_s7, 4294967168  ;;  %v216_v0 = vld [vmem:[%s190_s8] sm:$0xff]  ;;  %vm223_vm0 = vcmask 1043456   ;;  %v631_v12 = vmov 1024.0   ;;  %v289_v15 = vld [vmem:[%s807_s1] sm:$0xf] }
  0x29   : > { %218 = vst [vmem:[#allocation1] ss:$2 sm:$0xff] %v216_v0  ;;  %v245_v1 = vmul.f32 %v216_v0, %v216_v0  ;;  %529 = vrcp.f32 %v631_v12  ;;  %vm293_vm1 = vcmask 31744   ;;  %s632_s23 = smov 0.0   ;;  %v633_v44 = vmov 0  }
  0x2a   : > { %527 = vset.pattern.permute.xlu1 %v633_v44  ;;  %528 = vset.pattern.permute.xlu0 %v633_v44  ;;  %v343_v45 = vld [vmem:[%s809_s3] sm:$0xf] }
  0x2b   : > { %v341_v47 = vld [vmem:[%s808_s2] sm:$0xf] }
  0x2f   : > { %v530_v16 = vpop.eup %529 }
  0x30   : > { %v219_v2 = vld.sshfl [vmem:[#allocation1] sm:$0xff pattern:$0x75316420]  ;;  %v220_v3 = vld.sshfl [vmem:[#allocation1 + $0x8] sm:$0xff pattern:$0x75316420]  ;;  %vm241_vm2 = vweird.f32 %v530_v16 }
  0x31   : > { %v224_v4 = vsel %vm223_vm0, %v219_v2, 0.0  ;;  %v225_v5 = vsel %vm223_vm0, %v220_v3, 0.0  ;;  %247 = vst [vmem:[#allocation1] ss:$2 sm:$0xff] %v245_v1  ;;  %v237_v17 = vmul.f32 1024.0, %v530_v16 }
  0x32   : > { %v226_v6 = vadd.f32 %v225_v5, %v224_v4 }
  0x33   : > { %v238_v18 = vsub.f32 1.0, %v237_v17 }
  0x34   : > { %227 = vadd.xlane.f32.xlu0 %v226_v6 }
  0x35   : > { %v239_v22 = vmul.f32 %v530_v16, %v238_v18 }
  0x37   : > { %v240_v25 = vadd.f32 %v530_v16, %v239_v22 }
  0x38   : > { %v248_v7 = vld.sshfl [vmem:[#allocation1] sm:$0xff pattern:$0x75316420]  ;;  %v249_v8 = vld.sshfl [vmem:[#allocation1 + $0x8] sm:$0xff pattern:$0x75316420] }
  0x39   : > { %v252_v9 = vsel %vm223_vm0, %v248_v7, 0.0  ;;  %v253_v10 = vsel %vm223_vm0, %v249_v8, 0.0  ;;  %290 = vst [vmem:[#allocation1] ss:$2 sm:$0xff] %v216_v0  ;;  %v242_v31 = vsel %vm241_vm2, %v530_v16, %v240_v25 }
  0x3a   : > { %v254_v11 = vadd.f32 %v253_v10, %v252_v9 }
  0x3c   : > { %255 = vadd.xlane.f32.xlu0 %v254_v11 }
  0x40   : > { %v291_v13 = vld.sshfl [vmem:[#allocation1] sm:$0xff pattern:$0x75316420]  ;;  %v292_v14 = vld.sshfl [vmem:[#allocation1 + $0x8] sm:$0xff pattern:$0x75316420] }
  0x41   : > { %459 = vmatpush.msk.msra.mxu0 %vm223_vm0, %v291_v13  ;;  %461 = vmatpush.msk.msra.mxu1 %vm223_vm0, %v292_v14 }
  0x42   : > { %460 = vmatmul.msk.f32.vlgmr.msra.gmra.mxu0 %vm293_vm1, %v289_v15  ;;  %462 = vmatmul.msk.f32.vlgmr.msra.gmra.mxu1 %vm293_vm1, %v289_v15 }
  0xa7   : > { %v228_v19 = vpop.xlane.xlu0 %227 }
  0xa8   : > { %v229_v20 = vrot.slane %v228_v19, 4 }
  0xaa   : > { %v230_v21 = vadd.f32 %v229_v20, %v228_v19 }
  0xac   : > { %v231_v23 = vrot.slane %v230_v21, 2 }
  0xae   : > { %v232_v24 = vadd.f32 %v231_v23, %v230_v21 }
  0xaf   : > { %v256_v26 = vpop.xlane.xlu0 %255 }
  0xb0   : > { %v257_v27 = vrot.slane %v256_v26, 4  ;;  %v233_v28 = vrot.slane %v232_v24, 1 }
  0xb2   : > { %v258_v29 = vadd.f32 %v257_v27, %v256_v26  ;;  %v234_v30 = vadd.f32 %v233_v28, %v232_v24 }
  0xb4   : > { %v259_v32 = vrot.slane %v258_v29, 2  ;;  %470 = vpush %v234_v30 }
  0xb5   : > { %472 = vpush %v242_v31 }
  0xb6   : > { %v260_v33 = vadd.f32 %v259_v32, %v258_v29 }
  0xb8   : > { %v261_v34 = vrot.slane %v260_v33, 1 }
  0xba   : > { %v262_v35 = vadd.f32 %v261_v34, %v260_v33 }
  0xbc   : > { %474 = vpush %v262_v35 }
  0xbf   : > { %v338_v51 = vpop.f32.mrf.mxu1  ;;  %v318_v52 = vpop.f32.mrf.mxu0 }
  0xe5   : > { %s471_s10 = spop %470 }
  0xe6   : > { %s473_s11 = spop %472 }
  0xe7   : > { %s244_s12 = smul.f32 %s473_s11, %s471_s10 }
  0xe9   : > { %s273_s13 = smul.f32 %s244_s12, %s244_s12 }
  0xed   : > { %s475_s14 = spop %474 }
  0xee   : > { %s272_s20 = smul.f32 %s475_s14, %s473_s11  ;;  %s469_s11 = sshll.u32 %s680_s19, 3 }
  0xef   : > { %s375_s14 = scalar_lea.hbm %s810_s4, %s469_s11  ;;  %s364_s19 = scalar_lea.sflag [#allocation4], %s745_s29 }
  0xf0   : > { %s274_s22 = ssub.f32 %s272_s20, %s273_s13  ;;  %s215_s20 = scalar_lea.vmem [#allocation5], %s457_s6 }
  0xf1   : > { %s583_s6 = scalar_lea.hbm %s810_s4, 16 }
  0xf2   : > { %s275_s25 = smax.f32 %s632_s23, %s274_s22  ;;  %s377_s22 = sshll.u32 %s215_s20, 4  ;;  %s378_s22 = int_to_ptr.vmem [resolvable:$true] %s377_s22 }
  0xf3   : > { %s276_s30 = sadd.f32 1e-05, %s275_s25  ;;  %s379_s23 = sshll.u32 %s375_s14, 4  ;;  %s380_s23 = int_to_ptr.hbm [resolvable:$true] %s379_s23 }
  0xf4   : > { %s577_s25 = sshra.s32 %s380_s23, 4  ;;  %s578_s25 = int_to_ptr.hbm [resolvable:$true] %s577_s25 }
  0xf5   : > { %v277_v36 = vstv %s276_s30  ;;  %s579_s30 = scalar_lea.hbm %s578_s25, 8  ;;  %p584_p0 = scmp.lt.s32.totalorder %s578_s25, %s810_s4 }
  0xf6   : > { %531 = vrsqrt.f32 %v277_v36  ;;  %vm284_vm4 = vweird.f32 %v277_v36  ;;  %p580_p6 = scmp.ne.s32.totalorder %s578_s25, %s579_s30  ;;  %p585_p1 = scmp.lt.s32.totalorder %s583_s6, %s579_s30 }
  0xf8   : > { %p581_p9 = pnand %p580_p6, %p709_p11  ;;  %p586_p3 = por %p585_p1, %p584_p0 }
  0xfa   : > { %p582_p13 = pneg %p581_p9 }
  0xfc   : > { %v532_v37 = vpop.eup %531  ;;  %p587_p4 = pnand %p586_p3, %p582_p13 }
  0xfd   : > { %v279_v38 = vmul.f32 %v532_v37, %v277_v36  ;;  %vm285_vm3 = vweird.f32 %v532_v37 }
  0xfe   : > { %vm286_vm5 = vmor %vm284_vm4, %vm285_vm3 }
  0xff   : > { %v280_v39 = vmul.f32 %v532_v37, %v279_v38 }
 0x101   : > { %v281_v40 = vmul.f32 0.5, %v280_v39 }
 0x103   : > { %v282_v41 = vsub.f32 1.5, %v281_v40 }
 0x105   : > { %v283_v42 = vmul.f32 %v532_v37, %v282_v41 }
 0x107   : > { %v287_v43 = vsel %vm286_vm5, %v532_v37, %v283_v42 }
 0x108   : > { %476 = vpush %v287_v43 }
 0x139   : > { %s477_s5 = spop %476 }
 0x13a   : > { %s342_s7 = smul.f32 %s477_s5, %s244_s12  ;;  %v347_v50 = vstv %s477_s5 }
 0x13b   : > { %v349_v53 = vmul.f32 %v347_v50, %v338_v51  ;;  %v348_v55 = vmul.f32 %v347_v50, %v318_v52 }
 0x13c   : > { %v344_v46 = vstv %s342_s7 }
 0x13d   : > { %v345_v48 = vmul.f32 %v344_v46, %v343_v45 }
 0x13f   : > { %v346_v49 = vsub.f32 %v341_v47, %v345_v48 }
 0x141   : > { %352 = vperm.xlu1 %527, %v346_v49  }
 0x1b3   : > { %v353_v54 = vpop.permute.xlu1 %352 }
 0x1b4   : > { %v356_v56 = vadd.f32 %v353_v54, %v349_v53  ;;  %v355_v57 = vadd.f32 %v353_v54, %v348_v55 }
 0x1b6   : > { %v359_v58 = vrot.slane %v356_v56, 4 }
 0x1b8   : > { %v360_v59 = vsel %vm223_vm0, %v355_v57, %v359_v58 }
 0x1b9   : > { %362 = vst [vmem:[%s215_s20] sm:$0xff] %v360_v59 }
 0x1ba   : > { %590 = shalt.err (!%p587_p4)
}
 0x1bb   : > { %480 = dma.vmem_to_hbm [thread:$0]  (%p709_p11), %s378_s22, 128, %s380_s23, %s364_s19  }
 0x1bc PF: > { %s391_s29 = sand.u32 1, %s617_s15   ;;  %p816_p7 = scmp.ge.s32.totalorder %s629_s18, 2 }
 0x1bd   : > { %s392_s9 = scalar_lea.sflag [#allocation4], %s391_s29 }
 0x1be   : > { %p487_p5 = pnand %p816_p7, %p713_p12 }
 0x1c0   : > { %p488_p8 = pneg %p487_p5 }
 0x1c2   : > { %612 = dma.done.wait (%p488_p8), %s392_s9, 128  }
 0x1c3   : > { %614 = vsyncadd (%p488_p8), %s392_s9, 4294967168  ;;  %p17_p10 = scmp.ge.s32.totalorder %s684_s21, 4   ;;  %s817_s15 = smov %s621_s16 }
 0x1c4   : > { %s818_s16 = smov %s625_s17  ;;  %s819_s17 = smov %s696_s24 }
 0x1c5   : > { %s820_s18 = smov %s684_s21  ;;  %19 = sbr.rel (!%p17_p10) target bundleno = 5 (0x5), region = 81 }
 0x1ca   :  { %398 = vsyncpa [#allocation3], 1 }
 0x1cb   :  { %400 = vsyncpa [#allocation3 + $0x1], 1 }
 0x1cc   :  { %401 = vsyncpa [#allocation4], 1 }
 0x1cd   :  { %403 = vsyncpa [#allocation4 + $0x1], 1 }

</bundles_post_ra>
